<compile_context>
chip_gen: v7x
topology: tpu7x:2x2x1
jax: 0.10.0
libtpu: 0.0.40
codegen_flags: <defaults>
</compile_context>

<pallas_src>
import jax
import jax.numpy as jnp
from jax.experimental import pallas as pl
from jax.experimental.pallas import tpu as pltpu

LANE = 128


def _round_up(x, m):
    return ((x + m - 1) // m) * m


def _pick_node_tiling(n):
    # Tiles for streaming the (N, N) adjacency. bf16 A tile <= 512 KiB, so
    # double-buffered tiles + resident accumulator fit the default scoped VMEM
    # on v5e / v6e / v7x alike.
    if n >= 1024:
        tm, tk, mult = 512, 512, 512
    elif n >= 512:
        tm, tk, mult = 256, 512, 512
    else:
        tm, tk, mult = 128, 128, 128
    return tm, tk, _round_up(n, mult)


# ----------------------------- Pallas kernels --------------------------------
def xw_kernel(h_ref, w_ref, hw_ref):
    # HW[i-tile] = H[i-tile] @ W   (W is resident: (Fp, Hp) bf16, <= 32 KiB)
    hw_ref[...] = jnp.dot(
        h_ref[...], w_ref[...], preferred_element_type=jnp.float32
    ).astype(hw_ref.dtype)


def agg_kernel(a_ref, hw_ref, b_ref, out_ref, acc_ref):
    # out[i-tile] = ReLU( sum_k A[i-tile, k-tile] @ HW[k-tile] + b )
    k = pl.program_id(1)

    @pl.when(k == 0)
    def _():
        acc_ref[...] = jnp.zeros_like(acc_ref)

    acc_ref[...] += jnp.dot(
        a_ref[...], hw_ref[...], preferred_element_type=jnp.float32
    )

    @pl.when(k == pl.num_programs(1) - 1)
    def _():
        out_ref[...] = jnp.maximum(acc_ref[...] + b_ref[...], 0.0).astype(out_ref.dtype)


def pool_fc_kernel(p_ref, h_ref, invc_ref, wfc_ref, bfc_ref, out_ref, acc_ref):
    # acc = sum_k onehot[:, k-tile] @ H[k-tile]   (sum pool, f32 accumulation)
    k = pl.program_id(0)

    @pl.when(k == 0)
    def _():
        acc_ref[...] = jnp.zeros_like(acc_ref)

    acc_ref[...] += jnp.dot(
        p_ref[...], h_ref[...], preferred_element_type=jnp.float32
    )

    @pl.when(k == pl.num_programs(0) - 1)
    def _():
        pooled = acc_ref[...] * invc_ref[...]  # exact mean pool (f32 1/count)
        # Linear(hidden, 1) as a VPU reduction (a 1-lane MXU pass would be wasted)
        out_ref[...] = (
            jnp.sum(pooled * wfc_ref[...], axis=-1, keepdims=True) + bfc_ref[...]
        )


# --------------------------- pallas_call wrappers -----------------------------
def _xw_call(h, w, tm):
    n, f = h.shape
    hp = w.shape[1]
    return pl.pallas_call(
        xw_kernel,
        out_shape=jax.ShapeDtypeStruct((n, hp), jnp.bfloat16),
        grid_spec=pltpu.PrefetchScalarGridSpec(
            num_scalar_prefetch=0,
            grid=(n // tm,),
            in_specs=[
                pl.BlockSpec((tm, f), lambda i: (i, 0)),
                pl.BlockSpec((f, hp), lambda i: (0, 0)),
            ],
            out_specs=pl.BlockSpec((tm, hp), lambda i: (i, 0)),
        ),
        compiler_params=pltpu.CompilerParams(dimension_semantics=("parallel",)),
    )(h, w)


def _agg_call(a, hw, b, tm, tk):
    n = a.shape[0]
    hp = hw.shape[1]
    return pl.pallas_call(
        agg_kernel,
        out_shape=jax.ShapeDtypeStruct((n, hp), jnp.bfloat16),
        grid_spec=pltpu.PrefetchScalarGridSpec(
            num_scalar_prefetch=0,
            grid=(n // tm, n // tk),
            in_specs=[
                pl.BlockSpec((tm, tk), lambda i, k: (i, k)),
                pl.BlockSpec((tk, hp), lambda i, k: (k, 0)),
                pl.BlockSpec((1, hp), lambda i, k: (0, 0)),
            ],
            out_specs=pl.BlockSpec((tm, hp), lambda i, k: (i, 0)),
            scratch_shapes=[pltpu.VMEM((tm, hp), jnp.float32)],
        ),
        compiler_params=pltpu.CompilerParams(
            dimension_semantics=("parallel", "arbitrary")
        ),
    )(a, hw, b)


def _pool_fc_call(p, h, inv_cnt, wfc_row, bfc, tk):
    gp, n = p.shape
    hp = h.shape[1]
    return pl.pallas_call(
        pool_fc_kernel,
        out_shape=jax.ShapeDtypeStruct((gp, 1), jnp.float32),
        grid_spec=pltpu.PrefetchScalarGridSpec(
            num_scalar_prefetch=0,
            grid=(n // tk,),
            in_specs=[
                pl.BlockSpec((gp, tk), lambda k: (0, k)),
                pl.BlockSpec((tk, hp), lambda k: (k, 0)),
                pl.BlockSpec((gp, 1), lambda k: (0, 0)),
                pl.BlockSpec((1, hp), lambda k: (0, 0)),
                pl.BlockSpec((1, 1), lambda k: (0, 0)),
            ],
            out_specs=pl.BlockSpec((gp, 1), lambda k: (0, 0)),
            scratch_shapes=[pltpu.VMEM((gp, hp), jnp.float32)],
        ),
        compiler_params=pltpu.CompilerParams(dimension_semantics=("arbitrary",)),
    )(p, h, inv_cnt, wfc_row, bfc)


# ------------------------------- glue (JAX) ----------------------------------
def build_norm_adj(edge_index, edge_weight, num_nodes, dtype=jnp.float32):
    """Dense D^{-1/2} (A + I) D^{-1/2}, matching PyG GCNConv gcn_norm semantics."""
    src = edge_index[0]
    dst = edge_index[1]
    loop = jnp.arange(num_nodes, dtype=src.dtype)
    src = jnp.concatenate([src, loop])
    dst = jnp.concatenate([dst, loop])
    w = jnp.concatenate([edge_weight.astype(dtype), jnp.ones((num_nodes,), dtype)])
    deg = jnp.zeros((num_nodes,), dtype).at[dst].add(w)
    dinv = jnp.where(deg > 0, 1.0 / jnp.sqrt(deg), 0.0)
    norm = dinv[src] * w * dinv[dst]
    a_hat = jnp.zeros((num_nodes, num_nodes), dtype).at[dst, src].add(norm)
    return a_hat


def _pad2(x, rows, cols, dtype=None):
    r, c = x.shape
    out = jnp.pad(x, ((0, rows - r), (0, cols - c)))
    return out if dtype is None else out.astype(dtype)


def init_params(key, input_size, hidden_size):
    k = jax.random.split(key, 4)

    def glorot(kk, fan_in, fan_out):
        lim = jnp.sqrt(6.0 / (fan_in + fan_out))
        return jax.random.uniform(kk, (fan_in, fan_out), jnp.float32, -lim, lim)

    return {
        "w1": glorot(k[0], input_size, hidden_size),
        "b1": jnp.zeros((1, hidden_size), jnp.float32),
        "w2": glorot(k[1], hidden_size, hidden_size),
        "b2": jnp.zeros((1, hidden_size), jnp.float32),
        "w3": glorot(k[2], hidden_size, hidden_size),
        "b3": jnp.zeros((1, hidden_size), jnp.float32),
        "wfc": glorot(k[3], hidden_size, 1),
        "bfc": jnp.zeros((1, 1), jnp.float32),
    }


def gcn_model_forward(x, edge_index, edge_weight, batch_vec, params, num_graphs):
    n, f_in = x.shape
    hidden = params["w1"].shape[1]
    tm, tk, n_pad = _pick_node_tiling(n)
    f_pad = _round_up(f_in, LANE)
    h_pad = _round_up(hidden, LANE)
    g_pad = max(_round_up(num_graphs, 8), 8)

    # Dense normalized adjacency, zero-padded, streamed as bf16 tiles.
    a_hat = build_norm_adj(edge_index, edge_weight, n)
    a_hat = _pad2(a_hat, n_pad, n_pad, jnp.bfloat16)

    # Lane-padded node features and parameters (zero pad rows/cols are exact no-ops:
    # A_hat has zero columns for padded nodes and the pooling matrix ignores them).
    h = _pad2(x.astype(jnp.float32), n_pad, f_pad, jnp.bfloat16)
    w1 = _pad2(params["w1"], f_pad, h_pad, jnp.bfloat16)
    w2 = _pad2(params["w2"], h_pad, h_pad, jnp.bfloat16)
    w3 = _pad2(params["w3"], h_pad, h_pad, jnp.bfloat16)
    b1 = _pad2(params["b1"], 1, h_pad)
    b2 = _pad2(params["b2"], 1, h_pad)
    b3 = _pad2(params["b3"], 1, h_pad)
    wfc_row = _pad2(params["wfc"].T, 1, h_pad)  # (1, Hp) f32, used as VPU reduction
    bfc = params["bfc"]                          # (1, 1) f32

    # Mean pool: one-hot (sum) matrix in bf16 + exact f32 1/count applied in-kernel.
    batch_pad = jnp.concatenate(
        [batch_vec.astype(jnp.int32), -jnp.ones((n_pad - n,), jnp.int32)]
    )
    onehot = jnp.arange(g_pad, dtype=jnp.int32)[:, None] == batch_pad[None, :]
    counts = jnp.sum(onehot.astype(jnp.float32), axis=1, keepdims=True)
    inv_cnt = jnp.where(counts > 0, 1.0 / counts, 0.0)
    p_onehot = onehot.astype(jnp.bfloat16)

    # Three GCNConv + ReLU layers: per-layer H@W kernel then tiled aggregation kernel.
    for w, b in ((w1, b1), (w2, b2), (w3, b3)):
        hw = _xw_call(h, w, tm)
        h = _agg_call(a_hat, hw, b, tm, tk)

    out = _pool_fc_call(p_onehot, h, inv_cnt, wfc_row, bfc, tk)
    return out[:num_graphs, 0]  # matches x.view(-1) in the PyTorch module


# Pure-JAX reference (f32, un-tiled) for a correctness sanity check.
def _reference_forward(x, edge_index, edge_weight, batch_vec, params, num_graphs):
    n = x.shape[0]
    a = build_norm_adj(edge_index, edge_weight, n)
    h = x.astype(jnp.float32)
    for wk, bk in (("w1", "b1"), ("w2", "b2"), ("w3", "b3")):
        h = jnp.maximum(a @ (h @ params[wk]) + params[bk], 0.0)
    onehot = (jnp.arange(num_graphs)[:, None] == batch_vec[None, :]).astype(jnp.float32)
    pooled = (onehot @ h) / jnp.maximum(onehot.sum(1, keepdims=True), 1.0)
    return (pooled @ params["wfc"] + params["bfc"]).reshape(-1)


# --------------------------------- demo --------------------------------------
if __name__ == "__main__":
    key = jax.random.PRNGKey(0)
    k_x, k_w, k_ew = jax.random.split(key, 3)

    input_size = 8
    hidden_size = 32
    num_graphs = 2
    nodes_per_graph = 8
    num_nodes = num_graphs * nodes_per_graph  # 16

    # Node features (N, F_in)
    x = jax.random.normal(k_x, (num_nodes, input_size), jnp.float32)

    # Bidirectional ring edges within each graph (deterministic connectivity)
    srcs, dsts = [], []
    for g in range(num_graphs):
        base = g * nodes_per_graph
        for i in range(nodes_per_graph):
            a_node = base + i
            b_node = base + (i + 1) % nodes_per_graph
            srcs += [a_node, b_node]
            dsts += [b_node, a_node]
    edge_index = jnp.array([srcs, dsts], dtype=jnp.int32)  # (2, E)
    num_edges = edge_index.shape[1]
    edge_weight = jax.random.uniform(k_ew, (num_edges,), jnp.float32, 0.5, 1.5)

    # batch assignment vector (node -> graph id)
    batch_vec = jnp.repeat(jnp.arange(num_graphs, dtype=jnp.int32), nodes_per_graph)

    params = init_params(k_w, input_size, hidden_size)

    out = gcn_model_forward(x, edge_index, edge_weight, batch_vec, params, num_graphs)
    out = jax.block_until_ready(out)
    assert out.shape == (num_graphs,)
    assert bool(jnp.all(jnp.isfinite(out)))

    ref = _reference_forward(x, edge_index, edge_weight, batch_vec, params, num_graphs)
    assert bool(jnp.allclose(out, ref, atol=2e-1, rtol=2e-1)), (out, ref)

    print("KERNEL_OK")
</pallas_src>

<mosaic_0001>
module attributes {stable_mosaic.version = 11 : i64} {
  func.func @xw_kernel(%arg0: i32, %arg1: memref<128x128xbf16, #tpu.memory_space<vmem>>, %arg2: memref<128x128xbf16, #tpu.memory_space<vmem>>, %arg3: memref<128x128xbf16, #tpu.memory_space<vmem>>) attributes {dimension_semantics = [#tpu.dimension_semantics<parallel>], iteration_bounds = array<i64: 1>, scalar_prefetch = 0 : i64, scratch_operands = 0 : i64, tpu.core_type = #tpu.core_type<tc>, window_params = [{transform_indices = @transform_0, window_bounds = array<i64: 128, 128>}, {pipeline_mode = #tpu.pipeline_mode<synchronous>, transform_indices = @transform_1, window_bounds = array<i64: 128, 128>}, {transform_indices = @transform_2, window_bounds = array<i64: 128, 128>}]} {
    %c0 = arith.constant 0 : index
    %c0_0 = arith.constant 0 : index
    %0 = vector.load %arg1[%c0, %c0_0] : memref<128x128xbf16, #tpu.memory_space<vmem>>, vector<128x128xbf16>
    %c0_1 = arith.constant 0 : index
    %c0_2 = arith.constant 0 : index
    %1 = vector.load %arg2[%c0_1, %c0_2] : memref<128x128xbf16, #tpu.memory_space<vmem>>, vector<128x128xbf16>
    %cst = arith.constant dense<0.000000e+00> : vector<128x128xf32>
    %2 = tpu.matmul %0, %1, %cst {dimension_numbers = #tpu.dot_dimension_numbers<[1], [0], [0], [1], [0, 0, 1, 1], [], []>} : vector<128x128xbf16>, vector<128x128xbf16>, vector<128x128xf32> -> vector<128x128xf32>
    %3 = arith.truncf %2 : vector<128x128xf32> to vector<128x128xbf16>
    %c0_3 = arith.constant 0 : index
    %c0_4 = arith.constant 0 : index
    %4 = vector.load %arg3[%c0_3, %c0_4] : memref<128x128xbf16, #tpu.memory_space<vmem>>, vector<128x128xbf16>
    tpu.vector_store %arg3[%c0_3, %c0_4], %3 {strides = array<i32>} : memref<128x128xbf16, #tpu.memory_space<vmem>>, vector<128x128xbf16>,
    return
  }
  func.func @transform_0(%arg0: i32) -> (i32, i32) {
    %c0_i32 = arith.constant 0 : i32
    %c0_i32_0 = arith.constant 0 : i32
    return %arg0, %c0_i32 : i32, i32
  }
  func.func @transform_1(%arg0: i32) -> (i32, i32) {
    %c0_i32 = arith.constant 0 : i32
    %c0_i32_0 = arith.constant 0 : i32
    %c0_i32_1 = arith.constant 0 : i32
    return %c0_i32, %c0_i32_0 : i32, i32
  }
  func.func @transform_2(%arg0: i32) -> (i32, i32) {
    %c0_i32 = arith.constant 0 : i32
    %c0_i32_0 = arith.constant 0 : i32
    return %arg0, %c0_i32 : i32, i32
  }
}

</mosaic_0001>

<bundles_post_ra>
// kernel: tpu_custom_call.1
= control target key start
LH: loop header
LB: loop body
LE: loop exit
PB: predicated region body
PF: predicated region fallthrough
CT: control target
= control target key end

     0   :  { %7 = vsyncpa [#allocation3], 0  ;;  %s681_s0 = inlined_call_operand.hbm [shape: bf16[128,128], index: 0, kind: input, shape index: {}]   ;;  %s682_s1 = inlined_call_operand.hbm [shape: bf16[128,128], index: 1, kind: input, shape index: {}]   ;;  %s683_s2 = inlined_call_operand.hbm [shape: bf16[128,128], index: 2, kind: output, shape index: {}]  }
   0x1   :  { %8 = vsyncpa [#allocation6], 0 }
   0x2   :  { %9 = vsyncpa [#allocation4], 0  ;;  %s616_s9 = smov [#allocation2]   ;;  %s544_s13 = scalar_lea.hbm %s681_s0, 1024 }
   0x3   :  { %s15_s10 = sshll.u32 %s616_s9, 4  ;;  %p545_p0 = scmp.ne.s32.totalorder %s681_s0, %s544_s13  ;;  %s16_s10 = int_to_ptr.vmem [resolvable:$true] %s15_s10 }
   0x4   :  { %p548_p1 = scmp.lt.u32.totalorder %s544_s13, %s681_s0 }
   0x6   :  { %p550_p2 = pnand %p548_p1, %p545_p0 }
   0x8   :  { %553 = shalt.err (!%p550_p2)
}
   0x9   :  { %s554_s18 = scalar_lea.vmem %s16_s10, 1024  ;;  %p559_p4 = scmp.lt.s32.totalorder %s16_s10, %s16_s10 }
   0xa   :  { %p555_p3 = scmp.ne.s32.totalorder %s16_s10, %s554_s18  ;;  %p560_p5 = scmp.lt.s32.totalorder %s554_s18, %s554_s18 }
   0xc   :  { %p561_p6 = por %p560_p5, %p559_p4 }
   0xe   :  { %p562_p7 = pnand %p561_p6, %p555_p3 }
  0x10   :  { %565 = shalt.err (!%p562_p7)
}
  0x11   :  { %s617_s19 = smov 64   ;;  %s618_s20 = smov 4  }
  0x12   :  { %21 = dma.hbm_to_vmem [thread:$0]  %s681_s0, 1024, %s16_s10, [#allocation3], %s617_s19, %s617_s19, %s618_s20  }
  0x13   :  { %s619_s23 = smov [#allocation5]   ;;  %s566_s27 = scalar_lea.hbm %s682_s1, 1024 }
  0x14   :  { %s27_s24 = sshll.u32 %s619_s23, 4  ;;  %p567_p8 = scmp.ne.s32.totalorder %s682_s1, %s566_s27  ;;  %s28_s24 = int_to_ptr.vmem [resolvable:$true] %s27_s24 }
  0x15   :  { %p570_p9 = scmp.lt.u32.totalorder %s566_s27, %s682_s1 }
  0x17   :  { %p572_p10 = pnand %p570_p9, %p567_p8 }
  0x19   :  { %575 = shalt.err (!%p572_p10)
}
  0x1a   :  { %s576_s4 = scalar_lea.vmem %s28_s24, 1024  ;;  %p581_p12 = scmp.lt.s32.totalorder %s28_s24, %s28_s24 }
  0x1b   :  { %p577_p11 = scmp.ne.s32.totalorder %s28_s24, %s576_s4  ;;  %p582_p13 = scmp.lt.s32.totalorder %s576_s4, %s576_s4 }
  0x1d   :  { %p583_p0 = por %p582_p13, %p581_p12 }
  0x1f   :  { %p584_p1 = pnand %p583_p0, %p577_p11 }
  0x21   :  { %587 = shalt.err (!%p584_p1)
}
  0x22   :  { %33 = dma.hbm_to_vmem [thread:$0]  %s682_s1, 1024, %s28_s24, [#allocation6], %s617_s19, %s617_s19, %s618_s20  }
  0x23   :  { %610 = dma.done.wait [#allocation3], 1024  }
  0x24   :  { %611 = vsyncadd [#allocation3], 4294966272 }
  0x25   :  { %612 = dma.done.wait [#allocation6], 1024  }
  0x26   :  { %613 = vsyncadd [#allocation6], 4294966272  ;;  %v528_v0 = vld [vmem:[#allocation5] sm:$0xff]   ;;  %v529_v1 = vld [vmem:[#allocation5 + $0x8] sm:$0xff]   ;;  %s620_s1 = smov [#allocation7]  }
  0x27   :  { %475 = vmatprep.subr.bf16.mxu0 %v528_v0  ;;  %507 = vmatprep.subr.bf16.mxu1 %v528_v0  ;;  %v530_v2 = vld [vmem:[#allocation5 + $0x10] sm:$0xff]   ;;  %v531_v3 = vld [vmem:[#allocation5 + $0x18] sm:$0xff]   ;;  %v536_v4 = vld [vmem:[#allocation2] sm:$0xff]   ;;  %s351_s6 = sshll.u32 %s620_s1, 4  ;;  %s352_s6 = int_to_ptr.vmem [resolvable:$true] %s351_s6 }
  0x28   :  { %476 = vmatpush3.bf16.msra.mxu0 %v528_v0  ;;  %515 = vmatpush3.bf16.msra.mxu1 %v528_v0  ;;  %v537_v5 = vld [vmem:[#allocation2 + $0x20] sm:$0xff]   ;;  %v533_v7 = vld [vmem:[#allocation5 + $0x28] sm:$0xff]   ;;  %v534_v8 = vld [vmem:[#allocation5 + $0x30] sm:$0xff]   ;;  %s588_s7 = scalar_lea.vmem %s352_s6, 1024  ;;  %p593_p3 = scmp.lt.s32.totalorder %s352_s6, %s352_s6 }
  0x29   :  { %477 = vmatprep.subr.bf16.mxu0 %v529_v1  ;;  %508 = vmatprep.subr.bf16.mxu1 %v529_v1  ;;  %v532_v6 = vld [vmem:[#allocation5 + $0x20] sm:$0xff]   ;;  %v535_v9 = vld [vmem:[#allocation5 + $0x38] sm:$0xff]   ;;  %v538_v10 = vld [vmem:[#allocation2 + $0x8] sm:$0xff]   ;;  %p589_p2 = scmp.ne.s32.totalorder %s352_s6, %s588_s7  ;;  %p594_p4 = scmp.lt.s32.totalorder %s588_s7, %s588_s7 }
  0x2a   :  { %491 = vmatprep.mubr.bf16.mxu0 %v536_v4  ;;  %499 = vmatprep.mubr.bf16.mxu1 %v537_v5  ;;  %v539_v11 = vld [vmem:[#allocation2 + $0x28] sm:$0xff]   ;;  %v540_v12 = vld [vmem:[#allocation2 + $0x10] sm:$0xff]   ;;  %v542_v14 = vld [vmem:[#allocation2 + $0x18] sm:$0xff]  }
  0x2b   :  { %v541_v13 = vld [vmem:[#allocation2 + $0x30] sm:$0xff]   ;;  %v543_v15 = vld [vmem:[#allocation2 + $0x38] sm:$0xff]   ;;  %p595_p5 = por %p594_p4, %p593_p3 }
  0x2c   :  { %478 = vmatpush3.bf16.msra.mxu0 %v529_v1  ;;  %516 = vmatpush3.bf16.msra.mxu1 %v529_v1 }
  0x2d   :  { %479 = vmatprep.subr.bf16.mxu0 %v530_v2  ;;  %509 = vmatprep.subr.bf16.mxu1 %v530_v2  ;;  %p596_p6 = pnand %p595_p5, %p589_p2 }
  0x30   :  { %480 = vmatpush3.bf16.msra.mxu0 %v530_v2  ;;  %517 = vmatpush3.bf16.msra.mxu1 %v530_v2 }
  0x31   :  { %481 = vmatprep.subr.bf16.mxu0 %v531_v3  ;;  %510 = vmatprep.subr.bf16.mxu1 %v531_v3 }
  0x34   :  { %482 = vmatpush3.bf16.msra.mxu0 %v531_v3  ;;  %518 = vmatpush3.bf16.msra.mxu1 %v531_v3 }
  0x35   :  { %483 = vmatprep.subr.bf16.mxu0 %v532_v6  ;;  %511 = vmatprep.subr.bf16.mxu1 %v532_v6 }
  0x38   :  { %484 = vmatpush3.bf16.msra.mxu0 %v532_v6  ;;  %519 = vmatpush3.bf16.msra.mxu1 %v532_v6 }
  0x39   :  { %485 = vmatprep.subr.bf16.mxu0 %v533_v7  ;;  %512 = vmatprep.subr.bf16.mxu1 %v533_v7 }
  0x3c   :  { %486 = vmatpush3.bf16.msra.mxu0 %v533_v7  ;;  %520 = vmatpush3.bf16.msra.mxu1 %v533_v7 }
  0x3d   :  { %487 = vmatprep.subr.bf16.mxu0 %v534_v8  ;;  %513 = vmatprep.subr.bf16.mxu1 %v534_v8 }
  0x40   :  { %488 = vmatpush3.bf16.msra.mxu0 %v534_v8  ;;  %521 = vmatpush3.bf16.msra.mxu1 %v534_v8 }
  0x41   :  { %489 = vmatprep.subr.bf16.mxu0 %v535_v9  ;;  %514 = vmatprep.subr.bf16.mxu1 %v535_v9 }
  0x44   :  { %490 = vmatpush3.bf16.msra.mxu0 %v535_v9  ;;  %522 = vmatpush3.bf16.msra.mxu1 %v535_v9 }
  0x47   :  { %492 = vmatmul.mubr.bf16.vlgmr.msra.gmra.mrb[0].mxu0 %v538_v10  ;;  %500 = vmatmul.mubr.bf16.vlgmr.msra.gmra.mrb[0].mxu1 %v539_v11 }
  0x48   :  { %495 = vmatprep.mubr.bf16.mxu0 %v540_v12  ;;  %503 = vmatprep.mubr.bf16.mxu1 %v541_v13 }
  0x4f   :  { %496 = vmatmul.mubr.bf16.gmra.mrb[4].mxu0 %v542_v14  ;;  %504 = vmatmul.mubr.bf16.gmra.mrb[4].mxu1 %v543_v15 }
 0x11a   :  { %v493_v16 = vpop.f32.mrb[0].mxu0  ;;  %v501_v17 = vpop.f32.mrb[0].mxu1 }
 0x11b   :  { %v203_v18 = vpop.f32.mrb[1].mxu0  ;;  %v235_v19 = vpop.f32.mrb[1].mxu1 }
 0x11c   :  { %v494_v20 = vpop.f32.mrb[2].mxu0  ;;  %v502_v21 = vpop.f32.mrb[2].mxu1 }
 0x11d   :  { %v420_v22 = vpack.c.bf16 %v494_v20, %v493_v16  ;;  %v440_v23 = vpack.c.bf16 %v502_v21, %v501_v17  ;;  %v206_v24 = vpop.f32.mrb[3].mxu0  ;;  %v238_v25 = vpop.f32.mrb[3].mxu1 }
 0x11e   :  { %v415_v26 = vpack.c.bf16 %v206_v24, %v203_v18  ;;  %v435_v27 = vpack.c.bf16 %v238_v25, %v235_v19 }
 0x11f   :  { %452 = vst [vmem:[#allocation7 + $0x8] sm:$0xff] %v420_v22   ;;  %456 = vst [vmem:[#allocation7 + $0x28] sm:$0xff] %v440_v23  }
 0x120   :  { %416 = vst [vmem:[#allocation7] sm:$0xff] %v415_v26   ;;  %455 = vst [vmem:[#allocation7 + $0x20] sm:$0xff] %v435_v27  }
 0x122   :  { %v497_v28 = vpop.f32.mrb[4].mxu0  ;;  %v505_v29 = vpop.f32.mrb[4].mxu1 }
 0x123   :  { %v219_v30 = vpop.f32.mrb[5].mxu0  ;;  %v251_v31 = vpop.f32.mrb[5].mxu1 }
 0x124   :  { %v498_v32 = vpop.f32.mrb[6].mxu0  ;;  %v506_v33 = vpop.f32.mrb[6].mxu1 }
 0x125   :  { %v430_v34 = vpack.c.bf16 %v498_v32, %v497_v28  ;;  %v450_v35 = vpack.c.bf16 %v506_v33, %v505_v29  ;;  %v222_v36 = vpop.f32.mrb[7].mxu0  ;;  %v254_v37 = vpop.f32.mrb[7].mxu1 }
 0x126   :  { %v425_v38 = vpack.c.bf16 %v222_v36, %v219_v30  ;;  %v445_v39 = vpack.c.bf16 %v254_v37, %v251_v31 }
 0x127   :  { %454 = vst [vmem:[#allocation7 + $0x18] sm:$0xff] %v430_v34   ;;  %458 = vst [vmem:[#allocation7 + $0x38] sm:$0xff] %v450_v35  }
 0x128   :  { %453 = vst [vmem:[#allocation7 + $0x10] sm:$0xff] %v425_v38   ;;  %457 = vst [vmem:[#allocation7 + $0x30] sm:$0xff] %v445_v39  }
 0x129   :  { %599 = shalt.err (!%p596_p6)
}
 0x12a   :  { %s600_s10 = scalar_lea.hbm %s683_s2, 1024 }
 0x12b   :  { %p601_p7 = scmp.ne.s32.totalorder %s683_s2, %s600_s10  ;;  %p604_p8 = scmp.lt.u32.totalorder %s600_s10, %s683_s2 }
 0x12d   :  { %p606_p9 = pnand %p604_p8, %p601_p7 }
 0x12f   :  { %609 = shalt.err (!%p606_p9)
}
 0x130   :  { %357 = dma.vmem_to_hbm [thread:$0]  %s352_s6, 1024, %s683_s2, [#allocation4], %s617_s19, %s617_s19, %s618_s20  }
 0x131   :  { %614 = dma.done.wait [#allocation4], 1024  }
 0x132   :  { %615 = vsyncadd [#allocation4], 4294966272 }
 0x133   :  { %361 = vsyncpa [#allocation3], 1 }
 0x134   :  { %362 = vsyncpa [#allocation6], 1 }
 0x135   :  { %363 = vsyncpa [#allocation4], 1 }

</bundles_post_ra>
